<compile_context>
chip_gen: v7x
topology: tpu7x:2x2x1
jax: 0.10.0
libtpu: 0.0.40
codegen_flags: <defaults>
</compile_context>

<pallas_src>
from functools import partial

import jax
import jax.numpy as jnp
from jax.experimental import pallas as pl
from jax.experimental.pallas import tpu as pltpu


def _layer_norm(h, gamma, beta, eps=1e-5):
    mu = jnp.mean(h, axis=-1, keepdims=True)
    var = jnp.mean(jnp.square(h - mu), axis=-1, keepdims=True)
    return (h - mu) * jax.lax.rsqrt(var + eps) * gamma + beta


# ----------------------------------------------------------------------------
# Fused kernel: Conv1d(k=1) + nlayer post-norm transformer encoder layers
# grid = (batch_tiles, nlayer); layer axis innermost ("arbitrary"),
# batch axis "parallel" (megacore-shardable).
# ----------------------------------------------------------------------------
def _fused_trans_encoder_kernel(
    x_ref,    # (bt*S, C) f32  — conv input rows for this batch tile
    cw_ref,   # (C, D)    bf16 — conv weight, pre-transposed (in, out)
    cb_ref,   # (1, D)    f32  — conv bias
    w_ref,    # (nlayer, 6*D, D) bf16 — [Wq*scale; Wk; Wv; Wo; W1; W2] per layer
    v_ref,    # (nlayer, 16, D)  f32  — [bq*scale,bk,bv,bo,b1,b2,g1,be1,g2,be2,0..]
    o_ref,    # (S, bt, 1, D) f32 — sequence-major output block
    h_ref,    # VMEM scratch (bt*S, D) f32 — layer-resident activation
    *, d_model, seq,
):
    layer = pl.program_id(1)
    last_layer = pl.num_programs(1) - 1
    D, S = d_model, seq
    rows = h_ref.shape[0]
    bt = rows // S

    # ---- layer 0: fused Conv1d(kernel_size=1) seeds the resident activation
    @pl.when(layer == 0)
    def _():
        y = jnp.dot(x_ref[...].astype(jnp.bfloat16), cw_ref[...],
                    preferred_element_type=jnp.float32) + cb_ref[...]
        h_ref[...] = y

    # per-layer params sliced out of the two VMEM-resident slabs
    w = w_ref[layer]        # (6D, D) bf16 — sublane-aligned slices below
    vec = v_ref[layer]      # (16, D) f32
    wq, wk, wv = w[0:D, :], w[D:2 * D, :], w[2 * D:3 * D, :]
    wo, w1, w2 = w[3 * D:4 * D, :], w[4 * D:5 * D, :], w[5 * D:6 * D, :]
    bq, bk, bv = vec[0:1, :], vec[1:2, :], vec[2:3, :]
    bo, b1, b2 = vec[3:4, :], vec[4:5, :], vec[5:6, :]
    g1, be1 = vec[6:7, :], vec[7:8, :]
    g2, be2 = vec[8:9, :], vec[9:10, :]

    h = h_ref[...]                              # (bt*S, D) f32
    hb = h.astype(jnp.bfloat16)

    # --- single-head self-attention (1/sqrt(D) already folded into wq/bq) ---
    q = jnp.dot(hb, wq, preferred_element_type=jnp.float32) + bq
    k = jnp.dot(hb, wk, preferred_element_type=jnp.float32) + bk
    v = jnp.dot(hb, wv, preferred_element_type=jnp.float32) + bv

    qb = q.astype(jnp.bfloat16).reshape(bt, S, D)
    kb = k.astype(jnp.bfloat16).reshape(bt, S, D)
    vb = v.astype(jnp.bfloat16).reshape(bt, S, D)

    # batched contraction over features — no explicit k transpose
    scores = jnp.einsum("bqd,bkd->bqk", qb, kb,
                        preferred_element_type=jnp.float32)     # (bt, S, S)
    scores = scores - jnp.max(scores, axis=-1, keepdims=True)
    p = jnp.exp(scores)
    p = p * pl.reciprocal(jnp.sum(p, axis=-1, keepdims=True), approx=True)
    ctx = jnp.einsum("bqk,bkd->bqd", p.astype(jnp.bfloat16), vb,
                     preferred_element_type=jnp.float32)        # (bt, S, D)
    attn = jnp.dot(ctx.reshape(rows, D).astype(jnp.bfloat16), wo,
                   preferred_element_type=jnp.float32) + bo

    # --- residual + LayerNorm1 (post-norm) ---
    h1 = _layer_norm(h + attn, g1, be1)

    # --- feed-forward: linear1 -> relu -> linear2 (dropout = identity) ---
    ff = jnp.maximum(
        jnp.dot(h1.astype(jnp.bfloat16), w1,
                preferred_element_type=jnp.float32) + b1, 0.0)
    ff = jnp.dot(ff.astype(jnp.bfloat16), w2,
                 preferred_element_type=jnp.float32) + b2

    # --- residual + LayerNorm2 ---
    h2 = _layer_norm(h1 + ff, g2, be2)
    h_ref[...] = h2

    # last layer: emit the module's out.permute(2,0,1) directly (seq-major)
    @pl.when(layer == last_layer)
    def _():
        o_ref[...] = jnp.transpose(h2.reshape(bt, S, D),
                                   (1, 0, 2)).reshape(S, bt, 1, D)


# ----------------------------------------------------------------------------
# Wrapper
# ----------------------------------------------------------------------------
def trans_encoder_forward(x, conv_w_t, conv_b, w_slab, v_slab, *, batch_split=2):
    # x: (N, C_in, L) f32.  Returns (L, N, D) like the PyTorch module.
    N, C, L = x.shape
    S = L
    nlayer, sixD, D = w_slab.shape
    assert sixD == 6 * D

    # Conv1d(k=1) rows: (N, C, L) -> (N, L, C) -> (N*L, C)
    x2d = jnp.transpose(x, (0, 2, 1)).reshape(N * S, C)

    # >=2 parallel programs when possible (both v7x TensorCores get work);
    # keep bt dividing N exactly so no uninitialized pad rows hit LayerNorm.
    if N >= batch_split and N % batch_split == 0:
        bt = N // batch_split
    else:
        bt = N
    nb = N // bt
    rows = bt * S

    # Scaling guard (v7x scoped VMEM default = 32 MiB): rough budget for the
    # resident slabs + activations + (bt, S, S) scores.
    # TODO(synk): if S/D/bt grow, tile attention over kv blocks (online softmax)
    # instead of materializing the full (bt, S, S) scores.
    est_vmem = (w_slab.size * 2 + v_slab.size * 4 + conv_w_t.size * 2
                + rows * C * 4 + 10 * rows * D * 4
                + 2 * bt * S * S * 4 + 2 * S * bt * D * 4)
    assert est_vmem < 32 * 1024 * 1024, "VMEM budget exceeded — re-tile"

    out4 = pl.pallas_call(
        partial(_fused_trans_encoder_kernel, d_model=D, seq=S),
        # unit dim keeps the last two block dims full-array / tiling-legal
        # while still letting the batch axis be split for megacore.
        out_shape=jax.ShapeDtypeStruct((S, N, 1, D), jnp.float32),
        grid=(nb, nlayer),
        in_specs=[
            pl.BlockSpec((rows, C), lambda b, l: (b, 0)),            # x tile
            pl.BlockSpec((C, D), lambda b, l: (0, 0)),               # conv w (resident)
            pl.BlockSpec((1, D), lambda b, l: (0, 0)),               # conv b (resident)
            pl.BlockSpec((nlayer, 6 * D, D), lambda b, l: (0, 0, 0)),  # weight slab (1 DMA)
            pl.BlockSpec((nlayer, 16, D), lambda b, l: (0, 0, 0)),     # vector slab (1 DMA)
        ],
        out_specs=pl.BlockSpec((S, bt, 1, D), lambda b, l: (0, b, 0, 0)),
        scratch_shapes=[pltpu.VMEM((rows, D), jnp.float32)],
        compiler_params=pltpu.CompilerParams(
            dimension_semantics=("parallel", "arbitrary"),
            vmem_limit_bytes=32 * 1024 * 1024),
    )(x2d, conv_w_t, conv_b, w_slab, v_slab)

    return out4.reshape(S, N, D)   # squeeze of unit dim — free bitcast


# ----------------------------------------------------------------------------
# Parameter init (deterministic, synthetic; pre-transposed, slab-packed)
# ----------------------------------------------------------------------------
def init_params(key, inc, d_model, nlayer):
    sc = 0.05
    dff = d_model                     # dim_feedforward = outc in the module
    scale = d_model ** -0.5           # nhead = 1 -> head_dim = d_model
    k_conv, k_cb, k_layers = jax.random.split(key, 3)

    conv_w_t = jax.random.normal(k_conv, (inc, d_model), jnp.float32) * sc
    conv_b = jax.random.normal(k_cb, (1, d_model), jnp.float32) * sc

    w_rows, v_rows = [], []
    for lk in jax.random.split(k_layers, nlayer):
        ks = jax.random.split(lk, 12)
        wq = jax.random.normal(ks[0], (d_model, d_model), jnp.float32) * sc
        wk = jax.random.normal(ks[1], (d_model, d_model), jnp.float32) * sc
        wv = jax.random.normal(ks[2], (d_model, d_model), jnp.float32) * sc
        wo = jax.random.normal(ks[3], (d_model, d_model), jnp.float32) * sc
        w1 = jax.random.normal(ks[4], (d_model, dff), jnp.float32) * sc
        w2 = jax.random.normal(ks[5], (dff, d_model), jnp.float32) * sc
        bq = jax.random.normal(ks[6], (d_model,), jnp.float32) * sc
        bk = jax.random.normal(ks[7], (d_model,), jnp.float32) * sc
        bv = jax.random.normal(ks[8], (d_model,), jnp.float32) * sc
        bo = jax.random.normal(ks[9], (d_model,), jnp.float32) * sc
        b1 = jax.random.normal(ks[10], (dff,), jnp.float32) * sc
        b2 = jax.random.normal(ks[11], (d_model,), jnp.float32) * sc
        g1 = jnp.ones((d_model,), jnp.float32)
        be1 = jnp.zeros((d_model,), jnp.float32)
        g2 = jnp.ones((d_model,), jnp.float32)
        be2 = jnp.zeros((d_model,), jnp.float32)

        # attention scale folded into Wq and bq (all weights stored (in, out))
        w_rows.append(jnp.concatenate([wq * scale, wk, wv, wo, w1, w2], axis=0))
        vecs = jnp.stack([bq * scale, bk, bv, bo, b1, b2, g1, be1, g2, be2], axis=0)
        vecs = jnp.concatenate([vecs, jnp.zeros((6, d_model), jnp.float32)], axis=0)
        v_rows.append(vecs)

    w_slab = jnp.stack(w_rows).astype(jnp.bfloat16)   # (nlayer, 6D, D)
    v_slab = jnp.stack(v_rows)                        # (nlayer, 16, D) f32
    return conv_w_t.astype(jnp.bfloat16), conv_b, w_slab, v_slab


if __name__ == "__main__":
    # Small shapes consistent with the module: batch=2, inc=16, outc=32,
    # seq(L)=8, nheads=1, nlayer=2.
    N, INC, OUTC, L, NLAYER = 2, 16, 32, 8, 2

    key = jax.random.PRNGKey(0)
    kx, kp = jax.random.split(key)
    x = jax.random.normal(kx, (N, INC, L), jnp.float32)

    conv_w_t, conv_b, w_slab, v_slab = init_params(kp, INC, OUTC, NLAYER)

    fwd = jax.jit(trans_encoder_forward)
    out = fwd(x, conv_w_t, conv_b, w_slab, v_slab)
    out = jax.block_until_ready(out)
    assert out.shape == (L, N, OUTC), out.shape
    assert bool(jnp.all(jnp.isfinite(out)))
    print("KERNEL_OK")
</pallas_src>

<mosaic_0001>
module attributes {stable_mosaic.version = 11 : i64} {
  func.func @_fused_trans_encoder_kernel(%arg0: i32, %arg1: i32, %arg2: memref<8x16xf32, #tpu.memory_space<vmem>>, %arg3: memref<16x32xbf16, #tpu.memory_space<vmem>>, %arg4: memref<1x32xf32, #tpu.memory_space<vmem>>, %arg5: memref<2x192x32xbf16, #tpu.memory_space<vmem>>, %arg6: memref<2x16x32xf32, #tpu.memory_space<vmem>>, %arg7: memref<8x1x1x32xf32, #tpu.memory_space<vmem>>, %arg8: memref<8x32xf32, #tpu.memory_space<vmem>>) attributes {dimension_semantics = [#tpu.dimension_semantics<parallel>, #tpu.dimension_semantics<arbitrary>], iteration_bounds = array<i64: 2, 2>, scalar_prefetch = 0 : i64, scratch_operands = 1 : i64, tpu.core_type = #tpu.core_type<tc>, window_params = [{transform_indices = @transform_0, window_bounds = array<i64: 8, 16>}, {pipeline_mode = #tpu.pipeline_mode<synchronous>, transform_indices = @transform_1, window_bounds = array<i64: 16, 32>}, {pipeline_mode = #tpu.pipeline_mode<synchronous>, transform_indices = @transform_2, window_bounds = array<i64: 1, 32>}, {pipeline_mode = #tpu.pipeline_mode<synchronous>, transform_indices = @transform_3, window_bounds = array<i64: 2, 192, 32>}, {pipeline_mode = #tpu.pipeline_mode<synchronous>, transform_indices = @transform_4, window_bounds = array<i64: 2, 16, 32>}, {transform_indices = @transform_5, window_bounds = array<i64: 8, 1, 1, 32>}]} {
    %c0_i32 = arith.constant 0 : i32
    %0 = arith.cmpi eq, %arg1, %c0_i32 : i32
    %1 = arith.extui %0 : i1 to i32
    %c0_i32_0 = arith.constant 0 : i32
    %2 = arith.cmpi ne, %1, %c0_i32_0 : i32
    scf.if %2 {
      %c0_29 = arith.constant 0 : index
      %c0_30 = arith.constant 0 : index
      %120 = vector.load %arg2[%c0_29, %c0_30] : memref<8x16xf32, #tpu.memory_space<vmem>>, vector<8x16xf32>
      %121 = arith.truncf %120 : vector<8x16xf32> to vector<8x16xbf16>
      %c0_31 = arith.constant 0 : index
      %c0_32 = arith.constant 0 : index
      %122 = vector.load %arg3[%c0_31, %c0_32] : memref<16x32xbf16, #tpu.memory_space<vmem>>, vector<16x32xbf16>
      %cst_33 = arith.constant dense<0.000000e+00> : vector<8x32xf32>
      %123 = tpu.matmul %121, %122, %cst_33 {dimension_numbers = #tpu.dot_dimension_numbers<[1], [0], [0], [1], [0, 0, 1, 1], [], []>} : vector<8x16xbf16>, vector<16x32xbf16>, vector<8x32xf32> -> vector<8x32xf32>
      %c0_34 = arith.constant 0 : index
      %c0_35 = arith.constant 0 : index
      %124 = vector.load %arg4[%c0_34, %c0_35] : memref<1x32xf32, #tpu.memory_space<vmem>>, vector<1x32xf32>
      %125 = vector.broadcast %124 : vector<1x32xf32> to vector<8x32xf32>
      %126 = arith.addf %123, %125 : vector<8x32xf32>
      %c0_36 = arith.constant 0 : index
      %c0_37 = arith.constant 0 : index
      %127 = vector.load %arg8[%c0_36, %c0_37] : memref<8x32xf32, #tpu.memory_space<vmem>>, vector<8x32xf32>
      tpu.vector_store %arg8[%c0_36, %c0_37], %126 {strides = array<i32>} : memref<8x32xf32, #tpu.memory_space<vmem>>, vector<8x32xf32>,
    } else {
    }
    %3 = arith.index_cast %arg1 : i32 to index
    %c0 = arith.constant 0 : index
    %c0_1 = arith.constant 0 : index
    %4 = vector.load %arg5[%3, %c0, %c0_1] : memref<2x192x32xbf16, #tpu.memory_space<vmem>>, vector<1x192x32xbf16>
    %5 = vector.shape_cast %4 : vector<1x192x32xbf16> to vector<192x32xbf16>
    %6 = arith.index_cast %arg1 : i32 to index
    %c0_2 = arith.constant 0 : index
    %c0_3 = arith.constant 0 : index
    %7 = vector.load %arg6[%6, %c0_2, %c0_3] : memref<2x16x32xf32, #tpu.memory_space<vmem>>, vector<1x16x32xf32>
    %8 = vector.shape_cast %7 : vector<1x16x32xf32> to vector<16x32xf32>
    %9 = vector.extract_strided_slice %5 {offsets = [0, 0], sizes = [32, 32], strides = [1, 1]} : vector<192x32xbf16> to vector<32x32xbf16>
    %10 = vector.extract_strided_slice %5 {offsets = [32, 0], sizes = [32, 32], strides = [1, 1]} : vector<192x32xbf16> to vector<32x32xbf16>
    %11 = vector.extract_strided_slice %5 {offsets = [64, 0], sizes = [32, 32], strides = [1, 1]} : vector<192x32xbf16> to vector<32x32xbf16>
    %12 = vector.extract_strided_slice %5 {offsets = [96, 0], sizes = [32, 32], strides = [1, 1]} : vector<192x32xbf16> to vector<32x32xbf16>
    %13 = vector.extract_strided_slice %5 {offsets = [128, 0], sizes = [32, 32], strides = [1, 1]} : vector<192x32xbf16> to vector<32x32xbf16>
    %14 = vector.extract_strided_slice %5 {offsets = [160, 0], sizes = [32, 32], strides = [1, 1]} : vector<192x32xbf16> to vector<32x32xbf16>
    %15 = vector.extract_strided_slice %8 {offsets = [0, 0], sizes = [1, 32], strides = [1, 1]} : vector<16x32xf32> to vector<1x32xf32>
    %16 = vector.extract_strided_slice %8 {offsets = [1, 0], sizes = [1, 32], strides = [1, 1]} : vector<16x32xf32> to vector<1x32xf32>
    %17 = vector.extract_strided_slice %8 {offsets = [2, 0], sizes = [1, 32], strides = [1, 1]} : vector<16x32xf32> to vector<1x32xf32>
    %18 = vector.extract_strided_slice %8 {offsets = [3, 0], sizes = [1, 32], strides = [1, 1]} : vector<16x32xf32> to vector<1x32xf32>
    %19 = vector.extract_strided_slice %8 {offsets = [4, 0], sizes = [1, 32], strides = [1, 1]} : vector<16x32xf32> to vector<1x32xf32>
    %20 = vector.extract_strided_slice %8 {offsets = [5, 0], sizes = [1, 32], strides = [1, 1]} : vector<16x32xf32> to vector<1x32xf32>
    %21 = vector.extract_strided_slice %8 {offsets = [6, 0], sizes = [1, 32], strides = [1, 1]} : vector<16x32xf32> to vector<1x32xf32>
    %22 = vector.extract_strided_slice %8 {offsets = [7, 0], sizes = [1, 32], strides = [1, 1]} : vector<16x32xf32> to vector<1x32xf32>
    %23 = vector.extract_strided_slice %8 {offsets = [8, 0], sizes = [1, 32], strides = [1, 1]} : vector<16x32xf32> to vector<1x32xf32>
    %24 = vector.extract_strided_slice %8 {offsets = [9, 0], sizes = [1, 32], strides = [1, 1]} : vector<16x32xf32> to vector<1x32xf32>
    %c0_4 = arith.constant 0 : index
    %c0_5 = arith.constant 0 : index
    %25 = vector.load %arg8[%c0_4, %c0_5] : memref<8x32xf32, #tpu.memory_space<vmem>>, vector<8x32xf32>
    %26 = arith.truncf %25 : vector<8x32xf32> to vector<8x32xbf16>
    %cst = arith.constant dense<0.000000e+00> : vector<8x32xf32>
    %27 = tpu.matmul %26, %9, %cst {dimension_numbers = #tpu.dot_dimension_numbers<[1], [0], [0], [1], [0, 0, 1, 1], [], []>} : vector<8x32xbf16>, vector<32x32xbf16>, vector<8x32xf32> -> vector<8x32xf32>
    %28 = vector.broadcast %15 : vector<1x32xf32> to vector<8x32xf32>
    %29 = arith.addf %27, %28 : vector<8x32xf32>
    %cst_6 = arith.constant dense<0.000000e+00> : vector<8x32xf32>
    %30 = tpu.matmul %26, %10, %cst_6 {dimension_numbers = #tpu.dot_dimension_numbers<[1], [0], [0], [1], [0, 0, 1, 1], [], []>} : vector<8x32xbf16>, vector<32x32xbf16>, vector<8x32xf32> -> vector<8x32xf32>
    %31 = vector.broadcast %16 : vector<1x32xf32> to vector<8x32xf32>
    %32 = arith.addf %30, %31 : vector<8x32xf32>
    %cst_7 = arith.constant dense<0.000000e+00> : vector<8x32xf32>
    %33 = tpu.matmul %26, %11, %cst_7 {dimension_numbers = #tpu.dot_dimension_numbers<[1], [0], [0], [1], [0, 0, 1, 1], [], []>} : vector<8x32xbf16>, vector<32x32xbf16>, vector<8x32xf32> -> vector<8x32xf32>
    %34 = vector.broadcast %17 : vector<1x32xf32> to vector<8x32xf32>
    %35 = arith.addf %33, %34 : vector<8x32xf32>
    %36 = arith.truncf %29 : vector<8x32xf32> to vector<8x32xbf16>
    %37 = vector.shape_cast %36 : vector<8x32xbf16> to vector<1x8x32xbf16>
    %38 = arith.truncf %32 : vector<8x32xf32> to vector<8x32xbf16>
    %39 = vector.shape_cast %38 : vector<8x32xbf16> to vector<1x8x32xbf16>
    %40 = arith.truncf %35 : vector<8x32xf32> to vector<8x32xbf16>
    %41 = vector.shape_cast %40 : vector<8x32xbf16> to vector<1x8x32xbf16>
    "tpu.trace_start"() <{level = 10 : i32, message = "bqd,bkd->bqk"}> : () -> ()
    %cst_8 = arith.constant dense<0.000000e+00> : vector<1x8x8xf32>
    %42 = tpu.matmul %37, %39, %cst_8 {dimension_numbers = #tpu.dot_dimension_numbers<[2], [2], [1], [1], [0, 0, 0, 1, 1, 1], [0], [0]>} : vector<1x8x32xbf16>, vector<1x8x32xbf16>, vector<1x8x8xf32> -> vector<1x8x8xf32>
    "tpu.trace_stop"() : () -> ()
    %cst_9 = arith.constant dense<0xFF800000> : vector<1x8xf32>
    %43 = vector.multi_reduction <maximumf>, %42, %cst_9 [2] : vector<1x8x8xf32> to vector<1x8xf32>
    %44 = vector.shape_cast %43 : vector<1x8xf32> to vector<1x8x1xf32>
    %45 = vector.broadcast %44 : vector<1x8x1xf32> to vector<1x8x8xf32>
    %46 = arith.subf %42, %45 : vector<1x8x8xf32>
    %47 = math.exp %46 : vector<1x8x8xf32>
    %cst_10 = arith.constant dense<0.000000e+00> : vector<1x8xf32>
    %48 = vector.multi_reduction <add>, %47, %cst_10 [2] : vector<1x8x8xf32> to vector<1x8xf32>
    %49 = vector.shape_cast %48 : vector<1x8xf32> to vector<1x8x1xf32>
    %50 = tpu.reciprocal %49 {approx = true} : vector<1x8x1xf32> -> vector<1x8x1xf32>
    %51 = vector.broadcast %50 : vector<1x8x1xf32> to vector<1x8x8xf32>
    %52 = arith.mulf %47, %51 : vector<1x8x8xf32>
    %53 = arith.truncf %52 : vector<1x8x8xf32> to vector<1x8x8xbf16>
    "tpu.trace_start"() <{level = 10 : i32, message = "bqk,bkd->bqd"}> : () -> ()
    %cst_11 = arith.constant dense<0.000000e+00> : vector<1x8x32xf32>
    %54 = tpu.matmul %53, %41, %cst_11 {dimension_numbers = #tpu.dot_dimension_numbers<[2], [1], [1], [2], [0, 0, 0, 1, 1, 2], [0], [0]>} : vector<1x8x8xbf16>, vector<1x8x32xbf16>, vector<1x8x32xf32> -> vector<1x8x32xf32>
    "tpu.trace_stop"() : () -> ()
    %55 = vector.shape_cast %54 : vector<1x8x32xf32> to vector<8x32xf32>
    %56 = arith.truncf %55 : vector<8x32xf32> to vector<8x32xbf16>
    %cst_12 = arith.constant dense<0.000000e+00> : vector<8x32xf32>
    %57 = tpu.matmul %56, %12, %cst_12 {dimension_numbers = #tpu.dot_dimension_numbers<[1], [0], [0], [1], [0, 0, 1, 1], [], []>} : vector<8x32xbf16>, vector<32x32xbf16>, vector<8x32xf32> -> vector<8x32xf32>
    %58 = vector.broadcast %18 : vector<1x32xf32> to vector<8x32xf32>
    %59 = arith.addf %57, %58 : vector<8x32xf32>
    %60 = arith.addf %25, %59 : vector<8x32xf32>
    %cst_13 = arith.constant dense<0.000000e+00> : vector<8xf32>
    %61 = vector.multi_reduction <add>, %60, %cst_13 [1] : vector<8x32xf32> to vector<8xf32>
    %62 = vector.shape_cast %61 : vector<8xf32> to vector<8x1xf32>
    %cst_14 = arith.constant 3.200000e+01 : f32
    %63 = vector.broadcast %cst_14 : f32 to vector<8x1xf32>
    %64 = arith.divf %62, %63 : vector<8x1xf32>
    %65 = vector.broadcast %64 : vector<8x1xf32> to vector<8x32xf32>
    %66 = arith.subf %60, %65 : vector<8x32xf32>
    %67 = arith.mulf %66, %66 : vector<8x32xf32>
    %cst_15 = arith.constant dense<0.000000e+00> : vector<8xf32>
    %68 = vector.multi_reduction <add>, %67, %cst_15 [1] : vector<8x32xf32> to vector<8xf32>
    %69 = vector.shape_cast %68 : vector<8xf32> to vector<8x1xf32>
    %cst_16 = arith.constant 3.200000e+01 : f32
    %70 = vector.broadcast %cst_16 : f32 to vector<8x1xf32>
    %71 = arith.divf %69, %70 : vector<8x1xf32>
    %72 = vector.broadcast %64 : vector<8x1xf32> to vector<8x32xf32>
    %73 = arith.subf %60, %72 : vector<8x32xf32>
    %cst_17 = arith.constant 9.99999974E-6 : f32
    %74 = vector.broadcast %cst_17 : f32 to vector<8x1xf32>
    %75 = arith.addf %71, %74 : vector<8x1xf32>
    %76 = math.rsqrt %75 : vector<8x1xf32>
    %77 = vector.broadcast %76 : vector<8x1xf32> to vector<8x32xf32>
    %78 = arith.mulf %73, %77 : vector<8x32xf32>
    %79 = vector.broadcast %21 : vector<1x32xf32> to vector<8x32xf32>
    %80 = arith.mulf %78, %79 : vector<8x32xf32>
    %81 = vector.broadcast %22 : vector<1x32xf32> to vector<8x32xf32>
    %82 = arith.addf %80, %81 : vector<8x32xf32>
    %83 = arith.truncf %82 : vector<8x32xf32> to vector<8x32xbf16>
    %cst_18 = arith.constant dense<0.000000e+00> : vector<8x32xf32>
    %84 = tpu.matmul %83, %13, %cst_18 {dimension_numbers = #tpu.dot_dimension_numbers<[1], [0], [0], [1], [0, 0, 1, 1], [], []>} : vector<8x32xbf16>, vector<32x32xbf16>, vector<8x32xf32> -> vector<8x32xf32>
    %85 = vector.broadcast %19 : vector<1x32xf32> to vector<8x32xf32>
    %86 = arith.addf %84, %85 : vector<8x32xf32>
    %cst_19 = arith.constant 0.000000e+00 : f32
    %87 = vector.broadcast %cst_19 : f32 to vector<8x32xf32>
    %88 = arith.maximumf %86, %87 : vector<8x32xf32>
    %89 = arith.truncf %88 : vector<8x32xf32> to vector<8x32xbf16>
    %cst_20 = arith.constant dense<0.000000e+00> : vector<8x32xf32>
    %90 = tpu.matmul %89, %14, %cst_20 {dimension_numbers = #tpu.dot_dimension_numbers<[1], [0], [0], [1], [0, 0, 1, 1], [], []>} : vector<8x32xbf16>, vector<32x32xbf16>, vector<8x32xf32> -> vector<8x32xf32>
    %91 = vector.broadcast %20 : vector<1x32xf32> to vector<8x32xf32>
    %92 = arith.addf %90, %91 : vector<8x32xf32>
    %93 = arith.addf %82, %92 : vector<8x32xf32>
    %cst_21 = arith.constant dense<0.000000e+00> : vector<8xf32>
    %94 = vector.multi_reduction <add>, %93, %cst_21 [1] : vector<8x32xf32> to vector<8xf32>
    %95 = vector.shape_cast %94 : vector<8xf32> to vector<8x1xf32>
    %cst_22 = arith.constant 3.200000e+01 : f32
    %96 = vector.broadcast %cst_22 : f32 to vector<8x1xf32>
    %97 = arith.divf %95, %96 : vector<8x1xf32>
    %98 = vector.broadcast %97 : vector<8x1xf32> to vector<8x32xf32>
    %99 = arith.subf %93, %98 : vector<8x32xf32>
    %100 = arith.mulf %99, %99 : vector<8x32xf32>
    %cst_23 = arith.constant dense<0.000000e+00> : vector<8xf32>
    %101 = vector.multi_reduction <add>, %100, %cst_23 [1] : vector<8x32xf32> to vector<8xf32>
    %102 = vector.shape_cast %101 : vector<8xf32> to vector<8x1xf32>
    %cst_24 = arith.constant 3.200000e+01 : f32
    %103 = vector.broadcast %cst_24 : f32 to vector<8x1xf32>
    %104 = arith.divf %102, %103 : vector<8x1xf32>
    %105 = vector.broadcast %97 : vector<8x1xf32> to vector<8x32xf32>
    %106 = arith.subf %93, %105 : vector<8x32xf32>
    %cst_25 = arith.constant 9.99999974E-6 : f32
    %107 = vector.broadcast %cst_25 : f32 to vector<8x1xf32>
    %108 = arith.addf %104, %107 : vector<8x1xf32>
    %109 = math.rsqrt %108 : vector<8x1xf32>
    %110 = vector.broadcast %109 : vector<8x1xf32> to vector<8x32xf32>
    %111 = arith.mulf %106, %110 : vector<8x32xf32>
    %112 = vector.broadcast %23 : vector<1x32xf32> to vector<8x32xf32>
    %113 = arith.mulf %111, %112 : vector<8x32xf32>
    %114 = vector.broadcast %24 : vector<1x32xf32> to vector<8x32xf32>
    %115 = arith.addf %113, %114 : vector<8x32xf32>
    %c0_26 = arith.constant 0 : index
    %c0_27 = arith.constant 0 : index
    %116 = vector.load %arg8[%c0_26, %c0_27] : memref<8x32xf32, #tpu.memory_space<vmem>>, vector<8x32xf32>
    tpu.vector_store %arg8[%c0_26, %c0_27], %115 {strides = array<i32>} : memref<8x32xf32, #tpu.memory_space<vmem>>, vector<8x32xf32>,
    %c1_i32 = arith.constant 1 : i32
    %117 = arith.cmpi eq, %arg1, %c1_i32 : i32
    %118 = arith.extui %117 : i1 to i32
    %c0_i32_28 = arith.constant 0 : i32
    %119 = arith.cmpi ne, %118, %c0_i32_28 : i32
    scf.if %119 {
      %120 = vector.shape_cast %115 : vector<8x32xf32> to vector<1x8x32xf32>
      %121 = tpu.transpose %120, [1, 0, 2] : vector<1x8x32xf32> -> vector<8x1x32xf32>
      %122 = vector.shape_cast %121 : vector<8x1x32xf32> to vector<8x1x1x32xf32>
      %c0_29 = arith.constant 0 : index
      %c0_30 = arith.constant 0 : index
      %c0_31 = arith.constant 0 : index
      %c0_32 = arith.constant 0 : index
      %123 = vector.load %arg7[%c0_29, %c0_30, %c0_31, %c0_32] : memref<8x1x1x32xf32, #tpu.memory_space<vmem>>, vector<8x1x1x32xf32>
      tpu.vector_store %arg7[%c0_29, %c0_30, %c0_31, %c0_32], %122 {strides = array<i32>} : memref<8x1x1x32xf32, #tpu.memory_space<vmem>>, vector<8x1x1x32xf32>,
    } else {
    }
    return
  }
  func.func @transform_0(%arg0: i32, %arg1: i32) -> (i32, i32) {
    %c0_i32 = arith.constant 0 : i32
    %c0_i32_0 = arith.constant 0 : i32
    return %arg0, %c0_i32 : i32, i32
  }
  func.func @transform_1(%arg0: i32, %arg1: i32) -> (i32, i32) {
    %c0_i32 = arith.constant 0 : i32
    %c0_i32_0 = arith.constant 0 : i32
    %c0_i32_1 = arith.constant 0 : i32
    return %c0_i32, %c0_i32_0 : i32, i32
  }
  func.func @transform_2(%arg0: i32, %arg1: i32) -> (i32, i32) {
    %c0_i32 = arith.constant 0 : i32
    %c0_i32_0 = arith.constant 0 : i32
    %c0_i32_1 = arith.constant 0 : i32
    return %c0_i32, %c0_i32_0 : i32, i32
  }
  func.func @transform_3(%arg0: i32, %arg1: i32) -> (i32, i32, i32) {
    %c0_i32 = arith.constant 0 : i32
    %c0_i32_0 = arith.constant 0 : i32
    %c0_i32_1 = arith.constant 0 : i32
    %c0_i32_2 = arith.constant 0 : i32
    return %c0_i32, %c0_i32_0, %c0_i32_1 : i32, i32, i32
  }
  func.func @transform_4(%arg0: i32, %arg1: i32) -> (i32, i32, i32) {
    %c0_i32 = arith.constant 0 : i32
    %c0_i32_0 = arith.constant 0 : i32
    %c0_i32_1 = arith.constant 0 : i32
    %c0_i32_2 = arith.constant 0 : i32
    return %c0_i32, %c0_i32_0, %c0_i32_1 : i32, i32, i32
  }
  func.func @transform_5(%arg0: i32, %arg1: i32) -> (i32, i32, i32, i32) {
    %c0_i32 = arith.constant 0 : i32
    %c0_i32_0 = arith.constant 0 : i32
    %c0_i32_1 = arith.constant 0 : i32
    %c0_i32_2 = arith.constant 0 : i32
    return %c0_i32, %arg0, %c0_i32_0, %c0_i32_1 : i32, i32, i32, i32
  }
}

</mosaic_0001>

<bundles_post_ra>
// kernel: trans_encoder_forward.1
= control target key start
LH: loop header
LB: loop body
LE: loop exit
PB: predicated region body
PF: predicated region fallthrough
CT: control target
= control target key end

     0   :  { %10 = vsyncpa [#allocation4], 0  ;;  %s1637_s0 = inlined_call_operand.vmem [shape: f32[16,16], index: 0, kind: input, shape index: {}]   ;;  %s1638_s1 = inlined_call_operand.vmem [shape: bf16[16,32], index: 1, kind: input, shape index: {}]   ;;  %s1639_s2 = inlined_call_operand.vmem [shape: f32[1,32], index: 2, kind: input, shape index: {}]   ;;  %s1640_s3 = inlined_call_operand.vmem [shape: bf16[2,192,32], index: 3, kind: input, shape index: {}]   ;;  %s1641_s4 = inlined_call_operand.vmem [shape: f32[2,16,32], index: 4, kind: input, shape index: {}]   ;;  %s1642_s5 = inlined_call_operand.hbm [shape: f32[8,2,1,32], index: 5, kind: output, shape index: {}]  }
   0x1   :  { %12 = vsyncpa [#allocation4 + $0x1], 0  ;;  %s1365_s18 = smov 0   ;;  %s1367_s19 = smov 0  }
   0x2   :  { %s1369_s20 = smov 0   ;;  %s1371_s21 = smov 0  }
   0x3   :  { %s1373_s22 = smov 0   ;;  %s1375_s23 = smov 0  }
   0x4   :  { %s1377_s24 = smov 0   ;;  %s1379_s25 = smov 0  }
   0x5 LB: > { %s997_s26 = sadd.s32 4294967295, %s1322_s25   ;;  %s998_s27 = sadd.s32 4294967294, %s1322_s25   ;;  %s1322_s25 = sphi %s1379_s25, %s18_s25   ;;  %s1318_s24 = sphi %s1377_s24, %s1651_s24   ;;  %s1314_s23 = sphi %s1375_s23, %s1650_s23   ;;  %s1310_s22 = sphi %s1373_s22, %s1649_s22   ;;  %s1306_s21 = sphi %s1371_s21, %s1648_s21   ;;  %s1302_s20 = sphi %s1369_s20, %s1647_s20   ;;  %s1298_s19 = sphi %s1367_s19, %s1646_s19   ;;  %s1294_s18 = sphi %s1365_s18, %s1645_s18  }
   0x6   : > { %s27_s28 = sadd.s32 1, %s1314_s23  ;;  %s30_s29 = sadd.s32 1, %s1318_s24 }
   0x7   : > { %p28_p0 = scmp.ge.s32.totalorder %s27_s28, 2  ;;  %p157_p1 = scmp.ne.s32.totalorder %s1302_s20, %s1298_s19 }
   0x8   : > { %p158_p2 = scmp.eq.s32.totalorder %s997_s26, 3  ;;  %p163_p4 = scmp.ne.s32.totalorder %s1298_s19, %s1294_s18 }
   0x9   : > { %s1653_s28 = smov (%p28_p0, %s27_s28), 0  ;;  %s1655_s29 = smov (!%p28_p0, %s30_s29), %s1318_s24 }
   0xa   : > { %p1414_p3 = por %p158_p2, %p157_p1  ;;  %p32_p5 = scmp.ge.s32.totalorder %s1655_s29, 2 }
   0xb   : > { %p164_p6 = scmp.eq.s32.totalorder %s998_s27, 3  ;;  %p1001_p7 = scmp.ge.s32.totalorder %s1322_s25, 1 }
   0xc   : > { %p201_p8 = scmp.lt.s32.totalorder %s1322_s25, 5  ;;  %s1657_s29 = smov (%p32_p5, %s1655_s29), 0 }
   0xd   : > { %p1424_p9 = por %p164_p6, %p163_p4  ;;  %s144_s7 = ssub.s32 %s1318_s24, %s1657_s29 }
   0xe   : > { %p202_p10 = pnand %p1001_p7, %p201_p8  ;;  %s147_s8 = sadd.s32 1, %s1302_s20 }
   0xf   : > { %p145_p11 = scmp.eq.s32.totalorder %s144_s7, 0  ;;  %s225_s10 = sand.u32 (!%p202_p10), 1, %s1298_s19  }
  0x10   : > { %205 = sbr.rel (%p202_p10) target bundleno = 2537 (0x9e9), region = 40  ;;  %p228_p12 = scmp.lt.s32.totalorder (!%p202_p10), %s1310_s22, 1 }
  0x11   : > { %s1432_s9 = scalar_select %p145_p11, %s1302_s20, %s147_s8  }
  0x12   : > { %s1002_s11 = sshll.u32 (!%p202_p10), %s225_s10, 3  ;;  %p1004_p13 = scmp.ne.s32.totalorder (!%p202_p10), %s1306_s21, 0 }
  0x13   : > { %s1442_s17 = scalar_lea.vmem (!%p202_p10), [#allocation3], %s1002_s11 }
  0x17   : > { %s229_s12 = scalar_select %p228_p12, %s1310_s22, 1 }
  0x18   : > { %236 = sbr.rel (%p1004_p13) target bundleno = 245 (0xf5), region = 44  ;;  %v1207_v0 = vld [vmem:[%s1638_s1] sm:$0xff] (!%p1004_p13)   ;;  %v1324_v1 = vmov (!%p1004_p13), 0.0   ;;  %vm1325_vm0 = vmmov (!%p1004_p13), 0   ;;  %vm254_vm1 = vcmask (!%p1004_p13), 130048   ;;  %vm298_vm2 = vcmask (!%p1004_p13), 261120  }
  0x19   : > { %s1003_s13 = sshll.u32 %s229_s12, 3  ;;  %1060 = vmatprep.subr.bf16.mxu0 (!%p1004_p13), %v1324_v1  ;;  %1062 = vmatprep.mubr.msk.bf16.mxu0 (!%p1004_p13), %vm1325_vm0, %v1324_v1  ;;  %v1005_v4 = vld [vmem:[%s1639_s2] ss:$0 sm:$0xff] (!%p1004_p13) }
  0x1a   : > { %s231_s16 = scalar_lea.vmem %s1637_s0, %s1003_s13  ;;  %1061 = vmatpush3.bf16.msra.mxu0 (!%p1004_p13), %v1207_v0 }
  0x1b   : > { %v237_v2 = vld [vmem:[%s231_s16] sm:$0xff] (!%p1004_p13) }
  0x1c   : > { %v238_v3 = vpack.c.bf16 (!%p1004_p13), %v237_v2, %v237_v2 }
  0x1e   : > { %1063 = vmatmul.mubr.msk.bf16.vlgmr.msra.gmra.mrb[0].mxu0 (!%p1004_p13), %vm254_vm1, %v238_v3 }
  0xf1   : > { %v292_v5 = vpop.f32.mrb[0].mxu0 }
  0xf2   : > { %v293_v6 = vadd.f32 %v1005_v4, %v292_v5  ;;  %v1064_v7 = vpop.f32.mrb[1].mxu0 }
  0xf3   : > { %v295_v8 = vpop.f32.mrb[2].mxu0 }
  0xf4   : > { %299 = vst.msk [vmem:[#allocation2] sm:$0xff] %vm298_vm2, %v293_v6  ;;  %v1065_v9 = vpop.f32.mrb[3].mxu0 }
  0xf5 PF: > { %s1035_s11 = smul.u32 96, %s1306_s21  ;;  %v1326_v10 = vmov 0.0   ;;  %vm1327_vm3 = vmmov 0   ;;  %vm349_vm4 = vcmask 261120   ;;  %v333_v17 = vlaneseq  ;;  %s1009_s15 = sshll.u32 %s1306_s21, 4 }
  0xf6   : > { %1074 = vmatprep.subr.bf16.mxu1 %v1326_v10  ;;  %1066 = vmatprep.subr.bf16.mxu0 %v1326_v10  ;;  %s328_s27 = scalar_lea.vmem %s1641_s4, %s1009_s15  ;;  %vm554_vm5 = vcmask 64512   ;;  %vm570_vm6 = vcmask 1043456   ;;  %p1030_p0 = scmp.ne.s32.totalorder %s1306_s21, 1 }
  0xf7   : > { %s1457_s14 = scalar_lea.vmem %s1640_s3, %s1035_s11  ;;  %1078 = vmatprep.mubr.msk.bf16.mxu1 %vm1327_vm3, %v1326_v10  ;;  %1070 = vmatprep.mubr.msk.bf16.mxu0 %vm1327_vm3, %v1326_v10  ;;  %v1485_v18 = vshrl.u32 %v333_v17, 7  ;;  %v1487_v19 = vld [vmem:[%s328_s27 + $0x8] sm:$0xff]  ;;  %v1494_v23 = vld [vmem:[%s328_s27] sm:$0xff]  ;;  %vm898_vm7 = vcmask (!%p1030_p0), 253952  }
  0xf8   : > { %v1208_v11 = vld [vmem:[%s1457_s14 + $0x10] sm:$0xff]   ;;  %v1209_v13 = vld [vmem:[%s1457_s14 + $0x18] sm:$0xff]   ;;  %v1210_v14 = vld [vmem:[%s1457_s14] sm:$0xff]  }
  0xf9   : > { %1075 = vmatpush3.bf16.msra.mxu1 %v1208_v11  ;;  %v1211_v15 = vld [vmem:[%s1457_s14 + $0x8] sm:$0xff]   ;;  %1067 = vmatpush3.bf16.msra.mxu0 %v1210_v14  ;;  %v335_v20 = vsub.s32 0, %v1485_v18  ;;  %v395_v22 = vsub.s32 1, %v1485_v18  ;;  %v1212_v39 = vld [vmem:[%s1457_s14 + $0x20] sm:$0xff]   ;;  %v451_v51 = vsub.s32 2, %v1485_v18  ;;  %v1214_v60 = vld [vmem:[%s1457_s14 + $0x30] sm:$0xff]  }
  0xfa   : > { %1076 = vmatprep.subr.bf16.mxu1 %v1326_v10  ;;  %1068 = vmatprep.subr.bf16.mxu0 %v1326_v10  ;;  %v1213_v40 = vld [vmem:[%s1457_s14 + $0x28] sm:$0xff]   ;;  %v1215_v1 = vld [vmem:[%s1457_s14 + $0x38] sm:$0xff]   ;;  %v617_v7 = vsub.s32 3, %v1485_v18 }
  0xfb   : > { %v1464_v12 = vld [vmem:[#allocation2] sm:$0xff]  ;;  %v1491_v21 = vrot.slane %v1487_v19, %v335_v20  ;;  %v396_v24 = vrot.slane %v1494_v23, %v395_v22  ;;  %v336_v28 = vrot.slane %v1494_v23, %v335_v20  ;;  %v452_v54 = vrot.slane %v1494_v23, %v451_v51 }
  0xfc   : > { %v332_v16 = vpack.c.bf16 %v1464_v12, %v1464_v12  ;;  %v618_v8 = vrot.slane %v1494_v23, %v617_v7 }
  0xfd   : > { %1077 = vmatpush3.bf16.msra.mxu1 %v1209_v13  ;;  %1069 = vmatpush3.bf16.msra.mxu0 %v1211_v15 }
  0xfe   : > { %1090 = vmatprep.subr.bf16.mxu1 %v1326_v10  ;;  %1082 = vmatprep.subr.bf16.mxu0 %v1326_v10 }
 0x100   : > { %1079 = vmatmul.mubr.msk.bf16.vlgmr.msra.gmra.mrb[0].mxu1 %vm349_vm4, %v332_v16  ;;  %1071 = vmatmul.mubr.msk.bf16.vlgmr.msra.gmra.mrb[0].mxu0 %vm349_vm4, %v332_v16 }
 0x101   : > { %1092 = vmatprep.mubr.msk.bf16.mxu1 %vm1327_vm3, %v1326_v10  ;;  %1086 = vmatprep.mubr.msk.bf16.mxu0 %vm1327_vm3, %v1326_v10 }
 0x102   : > { %1083 = vmatpush3.bf16.msra.mxu0 %v1212_v39 }
 0x103   : > { %1084 = vmatprep.subr.bf16.mxu0 %v1326_v10 }
 0x106   : > { %1085 = vmatpush3.bf16.msra.mxu0 %v1213_v40 }
 0x107   : > { %1096 = vmatprep.subr.bf16.mxu0 %v1326_v10 }
 0x109   : > { %1087 = vmatmul.mubr.msk.bf16.vlgmr.msra.gmra.mrb[4].mxu0 %vm349_vm4, %v332_v16 }
 0x10a   : > { %1098 = vmatprep.mubr.msk.bf16.mxu0 %vm1327_vm3, %v1326_v10 }
 0x1d3   : > { %v443_v25 = vpop.f32.mrb[0].mxu1  ;;  %v387_v30 = vpop.f32.mrb[0].mxu0 }
 0x1d4   : > { %v444_v26 = vadd.f32 %v443_v25, %v396_v24  ;;  %v1080_v27 = vpop.f32.mrb[1].mxu1  ;;  %v1072_v33 = vpop.f32.mrb[1].mxu0  ;;  %v388_v36 = vadd.f32 %v387_v30, %v336_v28  ;;  %v1216_v28 = vld [vmem:[%s1457_s14 + $0x40] sm:$0xff]  }
 0x1d5   : > { %v446_v29 = vpop.f32.mrb[2].mxu1  ;;  %v390_v34 = vpop.f32.mrb[2].mxu0  ;;  %v696_v33 = vsub.s32 7, %v1485_v18 }
 0x1d6   : > { %v506_v31 = vpack.c.bf16 %v444_v26, %v444_v26  ;;  %v1081_v32 = vpop.f32.mrb[3].mxu1  ;;  %v1073_v37 = vpop.f32.mrb[3].mxu0  ;;  %v505_v38 = vpack.c.bf16 %v388_v36, %v388_v36  ;;  %v1217_v29 = vld [vmem:[%s1457_s14 + $0x48] sm:$0xff]  }
 0x1d7   : > { %v691_v32 = vsub.s32 6, %v1485_v18  ;;  %v697_v37 = vrot.slane %v1494_v23, %v696_v33 }
 0x1d8   : > { %v512_v35 = vsel %vm349_vm4, %v506_v31, 0 }
 0x1d9   : > { %1091 = vmatpush3.bf16.xpose.msra.mxu1 %v512_v35  ;;  %v692_v34 = vrot.slane %v1494_v23, %v691_v32 }
 0x1da   : > { %1102 = vmatprep.subr.bf16.mxu1 %v1326_v10 }
 0x1dc   : > { %v499_v52 = vpop.f32.mrb[4].mxu0 }
 0x1dd   : > { %v1088_v53 = vpop.f32.mrb[5].mxu0  ;;  %v500_v57 = vadd.f32 %v499_v52, %v452_v54  ;;  %v763_v52 = vsub.s32 5, %v1485_v18 }
 0x1de   : > { %v502_v55 = vpop.f32.mrb[6].mxu0 }
 0x1df   : > { %v1089_v56 = vpop.f32.mrb[7].mxu0  ;;  %v507_v58 = vpack.c.bf16 %v500_v57, %v500_v57  ;;  %v764_v53 = vrot.slane %v1494_v23, %v763_v52 }
 0x1e0   : > { %1093 = vmatmul.mubr.msk.bf16.vlgmr.msra.gmra.mrb[4].mxu1 %vm349_vm4, %v505_v38 }
 0x1e1   : > { %1106 = vmatprep.mubr.msk.bf16.mxu1 %vm1327_vm3, %v1326_v10  ;;  %v572_v59 = vsel %vm570_vm6, %v507_v58, 0  ;;  %1103 = vmatpush3.bf16.msra.mxu1 %v1214_v60 }
 0x1e2   : > { %1097 = vmatpush3.bf16.msra.mxu0 %v572_v59  ;;  %1104 = vmatprep.subr.bf16.mxu1 %v1326_v10 }
 0x1e3   : > { %1110 = vmatprep.subr.bf16.mxu0 %v1326_v10 }
 0x1e5   : > { %1105 = vmatpush3.bf16.msra.mxu1 %v1215_v1 }
 0x1e6   : > { %1118 = vmatprep.subr.bf16.mxu1 %v1326_v10 }
 0x2b3   : > { %v548_v41 = vpop.f32.mrb[4].mxu1 }
 0x2b4   : > { %v1094_v42 = vpop.f32.mrb[5].mxu1  ;;  %v555_v43 = vsel %vm554_vm5, %v548_v41, -inf }
 0x2b5   : > { %556 = vmax.xlane.f32.xlu0 %v555_v43  ;;  %v551_v44 = vpop.f32.mrb[6].mxu1  ;;  %v1219_v42 = vld [vmem:[%s1457_s14 + $0x58] sm:$0xff]   ;;  %v702_v43 = vsub.s32 4, %v1485_v18 }
 0x2b6   : > { %v1095_v45 = vpop.f32.mrb[7].mxu1 }
 0x2b7   : > { %v703_v44 = vrot.slane %v1494_v23, %v702_v43 }
 0x342   : > { %v557_v46 = vpop.xlane.xlu0 %556 }
 0x343   : > { %v558_v47 = vsub.f32 %v548_v41, %v557_v46  ;;  %v1218_v41 = vld [vmem:[%s1457_s14 + $0x50] sm:$0xff]  }
 0x345   : > { %v559_v48 = vmul.f32 1.442695, %v558_v47 }
 0x347   : > { %1220 = vpow2.f32 %v559_v48 }
 0x351   : > { %v1221_v49 = vpop.eup %1220 }
 0x352   : > { %v561_v50 = vsel %vm554_vm5, %v1221_v49, 0.0 }
 0x353   : > { %562 = vadd.xlane.f32.xlu0 %v561_v50 }
 0x3e0   : > { %v563_v61 = vpop.xlane.xlu0 %562 }
 0x3e1   : > { %1222 = vrcp.f32 %v563_v61 }
 0x3eb   : > { %v1223_v62 = vpop.eup %1222 }
 0x3ec   : > { %v565_v63 = vmul.f32 %v1223_v62, %v1221_v49 }
 0x3ee   : > { %v566_v0 = vpack.c.bf16 %v565_v63, %v565_v63 }
 0x3f0   : > { %1099 = vmatmul.mubr.msk.bf16.vlgmr.msra.gmra.mrb[8].mxu0 %vm554_vm5, %v566_v0 }
 0x3f1   : > { %1114 = vmatprep.mubr.msk.bf16.mxu0 %vm1327_vm3, %v1326_v10  ;;  %1111 = vmatpush3.bf16.msra.mxu0 %v1216_v28 }
 0x3f2   : > { %1112 = vmatprep.subr.bf16.mxu0 %v1326_v10 }
 0x3f5   : > { %1113 = vmatpush3.bf16.msra.mxu0 %v1217_v29 }
 0x4c3   : > { %v608_v2 = vpop.f32.mrb[8].mxu0 }
 0x4c4   : > { %v614_v3 = vpack.c.bf16 %v608_v2, %v608_v2  ;;  %v1100_v4 = vpop.f32.mrb[9].mxu0 }
 0x4c5   : > { %v611_v5 = vpop.f32.mrb[10].mxu0  ;;  %v842_v4 = vrot.slane %v1487_v19, %v395_v22 }
 0x4c6   : > { %v1101_v6 = vpop.f32.mrb[11].mxu0  ;;  %1107 = vmatmul.mubr.msk.bf16.vlgmr.msra.gmra.mrb[8].mxu1 %vm349_vm4, %v614_v3 }
 0x4c7   : > { %1122 = vmatprep.mubr.msk.bf16.mxu1 %vm1327_vm3, %v1326_v10  ;;  %1119 = vmatpush3.bf16.msra.mxu1 %v1218_v41 }
 0x4c8   : > { %1120 = vmatprep.subr.bf16.mxu1 %v1326_v10 }
 0x4cb   : > { %1121 = vmatpush3.bf16.msra.mxu1 %v1219_v42 }
 0x599   : > { %v668_v9 = vpop.f32.mrb[8].mxu1 }
 0x59a   : > { %v669_v11 = vadd.f32 %v668_v9, %v618_v8  ;;  %v1108_v13 = vpop.f32.mrb[9].mxu1  ;;  %v1328_v8 = vmov (!%p1030_p0), 1983009808  }
 0x59b   : > { %v671_v14 = vpop.f32.mrb[10].mxu1  ;;  %v851_v9 = vunpack.c.l.s4 (!%p1030_p0), %v1328_v8 }
 0x59c   : > { %v1109_v15 = vpop.f32.mrb[11].mxu1  ;;  %v674_v16 = vadd.f32 %v669_v11, %v1464_v12  ;;  %v1329_v11 = vmov (!%p1030_p0), 1934713408  }
 0x59d   : > { %v866_v13 = vunpack.c.l.s4 (!%p1030_p0), %v1329_v11  ;;  %v852_v14 = vunpack.c.0.s8 (!%p1030_p0), %v851_v9 }
 0x59e   : > { %v675_v17 = vsel %vm349_vm4, %v674_v16, 0.0 }
 0x59f   : > { %676 = vadd.xlane.f32.xlu1 %v675_v17  ;;  %v867_v15 = vunpack.c.0.s8 (!%p1030_p0), %v866_v13  ;;  %v855_v19 = vsub.s32 (!%p1030_p0), %v852_v14, %v1485_v18 }
 0x62c   : > { %v677_v20 = vpop.xlane.xlu1 %676 }
 0x62d   : > { %v679_v24 = vmul.f32 0.03125, %v677_v20 }
 0x62f   : > { %v680_v25 = vsub.f32 %v674_v16, %v679_v24  ;;  %v1330_v16 = vmov (!%p1030_p0), 0.0  }
 0x631   : > { %v681_v26 = vmul.f32 %v680_v25, %v680_v25 }
 0x633   : > { %v682_v27 = vsel %vm349_vm4, %v681_v26, 0.0 }
 0x634   : > { %683 = vadd.xlane.f32.xlu1 %v682_v27 }
 0x6c1   : > { %v684_v30 = vpop.xlane.xlu1 %683 }
 0x6c2   : > { %v685_v31 = vmul.f32 0.03125, %v684_v30 }
 0x6c4   : > { %v686_v12 = vadd.f32 1e-05, %v685_v31 }
 0x6c6   : > { %1224 = vrsqrt.f32 %v686_v12 }
 0x6d0   : > { %v1225_v35 = vpop.eup %1224 }
 0x6d1   : > { %v688_v36 = vmul.f32 %v1225_v35, %v680_v25 }
 0x6d3   : > { %v693_v38 = vmul.f32 %v692_v34, %v688_v36 }
 0x6d5   : > { %v698_v39 = vadd.f32 %v697_v37, %v693_v38 }
 0x6d7   : > { %v699_v40 = vpack.c.bf16 %v698_v39, %v698_v39 }
 0x6d9   : > { %1115 = vmatmul.mubr.msk.bf16.vlgmr.msra.gmra.mrb[12].mxu0 %vm349_vm4, %v699_v40 }
 0x7ac   : > { %v753_v45 = vpop.f32.mrb[12].mxu0 }
 0x7ad   : > { %v754_v46 = vadd.f32 %v753_v45, %v703_v44  ;;  %v1116_v47 = vpop.f32.mrb[13].mxu0 }
 0x7ae   : > { %v756_v48 = vpop.f32.mrb[14].mxu0 }
 0x7af   : > { %v759_v49 = vmax.f32 %v754_v46, 0.0  ;;  %v1117_v50 = vpop.f32.mrb[15].mxu0 }
 0x7b1   : > { %v760_v51 = vpack.c.bf16 %v759_v49, %v759_v49 }
 0x7b3   : > { %1123 = vmatmul.mubr.msk.bf16.vlgmr.msra.gmra.mrb[12].mxu1 %vm349_vm4, %v760_v51 }
 0x886   : > { %v814_v10 = vpop.f32.mrb[12].mxu1 }
 0x887   : > { %v815_v54 = vadd.f32 %v814_v10, %v764_v53  ;;  %v1124_v55 = vpop.f32.mrb[13].mxu1 }
 0x888   : > { %v817_v56 = vpop.f32.mrb[14].mxu1 }
 0x889   : > { %v1125_v57 = vpop.f32.mrb[15].mxu1  ;;  %v820_v58 = vadd.f32 %v815_v54, %v698_v39 }
 0x88b   : > { %v821_v59 = vsel %vm349_vm4, %v820_v58, 0.0 }
 0x88c   : > { %822 = vadd.xlane.f32.xlu0 %v821_v59 }
 0x919   : > { %v823_v60 = vpop.xlane.xlu0 %822 }
 0x91a   : > { %v824_v61 = vmul.f32 0.03125, %v823_v60 }
 0x91c   : > { %v825_v62 = vsub.f32 %v820_v58, %v824_v61 }
 0x91e   : > { %v826_v63 = vmul.f32 %v825_v62, %v825_v62 }
 0x920   : > { %v827_v0 = vsel %vm349_vm4, %v826_v63, 0.0 }
 0x921   : > { %828 = vadd.xlane.f32.xlu1 %v827_v0 }
 0x9ae   : > { %v829_v1 = vpop.xlane.xlu1 %828 }
 0x9af   : > { %v830_v2 = vmul.f32 0.03125, %v829_v1 }
 0x9b1   : > { %v831_v3 = vadd.f32 1e-05, %v830_v2 }
 0x9b3   : > { %1226 = vrsqrt.f32 %v831_v3 }
 0x9bd   : > { %v1227_v23 = vpop.eup %1226 }
 0x9be   : > { %v833_v5 = vmul.f32 %v1227_v23, %v825_v62  ;;  %848 = sbr.rel (%p1030_p0) target bundleno = 2511 (0x9cf), region = 48 }
 0x9c0   : > { %v838_v6 = vmul.f32 %v1491_v21, %v833_v5  ;;  %v870_v21 = vsub.s32 (!%p1030_p0), %v867_v15, %v1485_v18 }
 0x9c2   : > { %v843_v7 = vadd.f32 %v842_v4, %v838_v6 }
 0x9c4   : > { %844 = vst.msk [vmem:[#allocation2] sm:$0xff] %vm349_vm4, %v843_v7  ;;  %v849_v17 = vcombine.high (!%p1030_p0), %v843_v7, %v1330_v16  ;;  %v856_v22 = vrot.slane (!%p1030_p0), %v843_v7, %v855_v19 }
 0x9c6   : > { %v863_v20 = vrot.slane %v849_v17, %v855_v19  ;;  %v871_v24 = vrot.slane %v856_v22, %v870_v21  ;;  %v864_v25 = vcombine.high %v856_v22, %v1330_v16 }
 0x9c8   : > { %v886_v26 = vrot.slane %v863_v20, %v870_v21  ;;  %v879_v27 = vcombine.high %v863_v20, %v1330_v16  ;;  %899 = vst.msk [vmem:[%s1442_s17] sm:$0x1] %vm898_vm7, %v871_v24  ;;  %v894_v28 = vcombine.high %v871_v24, %v1330_v16  ;;  %v878_v29 = vrot.slane %v864_v25, %v870_v21 }
 0x9ca   : > { %903 = vst.msk [vmem:[%s1442_s17 + $0x4] sm:$0x1] %vm898_vm7, %v886_v26  ;;  %v896_v30 = vcombine.high %v886_v26, %v1330_v16  ;;  %v893_v31 = vrot.slane %v879_v27, %v870_v21  ;;  %900 = vst.msk [vmem:[%s1442_s17 + $0x1] sm:$0x1] %vm898_vm7, %v894_v28  ;;  %v895_v18 = vcombine.high %v878_v29, %v1330_v16 }
 0x9cb   : > { %901 = vst.msk [vmem:[%s1442_s17 + $0x2] sm:$0x1] %vm898_vm7, %v878_v29 }
 0x9cc   : > { %904 = vst.msk [vmem:[%s1442_s17 + $0x5] sm:$0x1] %vm898_vm7, %v896_v30  ;;  %905 = vst.msk [vmem:[%s1442_s17 + $0x6] sm:$0x1] %vm898_vm7, %v893_v31  ;;  %v897_v12 = vcombine.high %v893_v31, %v1330_v16 }
 0x9cd   : > { %902 = vst.msk [vmem:[%s1442_s17 + $0x3] sm:$0x1] %vm898_vm7, %v895_v18 }
 0x9ce   : > { %906 = vst.msk [vmem:[%s1442_s17 + $0x7] sm:$0x1] %vm898_vm7, %v897_v12 }
 0x9cf PF: > { %s1032_s21 = sshll.u32 %s1310_s22, 4  ;;  %s920_s12 = sshll.u32 %s1442_s17, 4  ;;  %s1581_s12 = int_to_ptr.vmem [resolvable:$true] %s920_s12 }
 0x9d0   : > { %s1578_s11 = scalar_lea.hbm %s1642_s5, %s1032_s21  ;;  %s1585_s13 = scalar_lea.sflag [#allocation4], %s225_s10 }
 0x9d1   : > { %s1228_s14 = scalar_lea.vmem %s1581_s12, 128  ;;  %s1331_s22 = smov [#allocation3]  }
 0x9d2   : > { %p1229_p1 = scmp.ne.s32.totalorder %s1581_s12, %s1228_s14  ;;  %s1232_s15 = sshll.u32 %s1331_s22, 4  ;;  %s1233_s15 = int_to_ptr.vmem [resolvable:$false] %s1232_s15 }
 0x9d3   : > { %s1234_s16 = scalar_lea.vmem %s1233_s15, 256  ;;  %p1235_p5 = scmp.lt.s32.totalorder %s1581_s12, %s1233_s15 }
 0x9d4   : > { %p1230_p2 = pnand %p1229_p1, %p1414_p3  ;;  %p1236_p6 = scmp.lt.s32.totalorder %s1234_s16, %s1228_s14 }
 0x9d6   : > { %p1231_p4 = pneg %p1230_p2  ;;  %p1237_p7 = por %p1236_p6, %p1235_p5 }
 0x9d8   : > { %p1238_p8 = pnand %p1237_p7, %p1231_p4 }
 0x9da   : > { %1241 = shalt.err (!%p1238_p8)
}
 0x9db   : > { %s1242_s10 = scalar_lea.hbm %s1578_s11, 128  ;;  %s1246_s27 = scalar_lea.hbm %s1642_s5, 256 }
 0x9dc   : > { %p1243_p10 = scmp.ne.s32.totalorder %s1578_s11, %s1242_s10  ;;  %p1247_p13 = scmp.lt.u32.totalorder %s1578_s11, %s1642_s5 }
 0x9dd   : > { %p1248_p0 = scmp.lt.u32.totalorder %s1246_s27, %s1242_s10  ;;  %p1250_p2 = scmp.lt.u32.totalorder %s1242_s10, %s1578_s11 }
 0x9de   : > { %p1244_p11 = pnand %p1243_p10, %p1414_p3 }
 0x9df   : > { %p1249_p1 = por %p1248_p0, %p1247_p13 }
 0x9e0   : > { %p1245_p12 = pneg %p1244_p11 }
 0x9e1   : > { %p1251_p4 = por %p1250_p2, %p1249_p1 }
 0x9e3   : > { %p1252_p5 = pnand %p1251_p4, %p1245_p12 }
 0x9e5   : > { %1255 = shalt.err (!%p1252_p5)
}
 0x9e6   : > { %s1332_s8 = smov 16   ;;  %s1333_s14 = smov 32  }
 0x9e7   : > { %s1334_s22 = smov 1  }
 0x9e8   : > { %1126 = dma.vmem_to_hbm [thread:$0]  (%p1414_p3), %s1581_s12, 128, %s1578_s11, %s1585_s13, %s1332_s8, %s1333_s14, %s1334_s22  }
 0x9e9 PF: > { %p1132_p6 = scmp.ge.s32.totalorder %s1322_s25, 2  ;;  %s935_s15 = sand.u32 1, %s1294_s18  }
 0x9ea   : > { %s936_s16 = scalar_lea.sflag [#allocation4], %s935_s15 }
 0x9eb   : > { %p1129_p7 = pnand %p1132_p6, %p1424_p9 }
 0x9ed   : > { %1289 = dma.done.wait (!%p1129_p7), %s936_s16, 128  }
 0x9ee   : > { %1291 = vsyncadd (!%p1129_p7), %s936_s16, 4294967168  ;;  %s18_s25 = sadd.s32 1, %s1322_s25   ;;  %s1645_s18 = smov %s1298_s19 }
 0x9ef   : > { %p15_p8 = scmp.ge.s32.totalorder %s18_s25, 6   ;;  %s1646_s19 = smov %s1302_s20 }
 0x9f0   : > { %s1647_s20 = smov %s1432_s9  ;;  %s1648_s21 = smov %s1314_s23 }
 0x9f1   : > { %s1649_s22 = smov %s1318_s24  ;;  %s1650_s23 = smov %s1653_s28 }
 0x9f2   : > { %s1651_s24 = smov %s1657_s29  ;;  %17 = sbr.rel (!%p15_p8) target bundleno = 5 (0x5), region = 85 }
 0x9f9   :  { %941 = vsyncpa [#allocation4], 1 }
 0x9fa   :  { %943 = vsyncpa [#allocation4 + $0x1], 1 }

</bundles_post_ra>
